<compile_context>
chip_gen: v5e
topology: v5e:2x2
jax: 0.10.0
libtpu: 0.0.40
codegen_flags: <defaults>
</compile_context>

<pallas_src>
from functools import partial

import jax
import jax.numpy as jnp
from jax.experimental import pallas as pl
from jax.experimental.pallas import tpu as pltpu


# In-kernel matmul chunking (keeps individual dot operands comfortably small).
_N_CHUNK = 512
_K_CHUNK = 1024


def _choose_row_tile(h, w, dim_in, in_itemsize, num_bt,
                     *, max_rows=1024, block_budget=4 << 20):
    """Pick ht (a divisor of h).  Rows per grid step = ht * w."""
    def legal(ht):
        rows = ht * w
        # Output block's second-minor dim must be 8-aligned or the full extent.
        if rows % 8 != 0 and ht != h:
            return False
        return rows * dim_in * in_itemsize <= block_budget

    divisors = [dv for dv in range(1, h + 1) if h % dv == 0]
    good = [dv for dv in divisors if legal(dv) and dv * w <= max_rows]
    if not good:
        good = [dv for dv in divisors if legal(dv)] or [h]
        # TODO(synk): if even ht==1 blows the budget (huge w*dim_in) the block
        #             should also be tiled along w; not needed for gaia2 sizes.
        good = [min(good)]
    ht = max(good)
    # Keep at least 2 parallel grid tiles for v7x's two TensorCores when possible.
    if num_bt == 1 and h // ht < 2:
        smaller = [dv for dv in good if h // dv >= 2]
        if smaller:
            ht = max(smaller)
    return ht


def _make_kernel(ft, fs, ht, w, d, dim_in, dim_out):
    fsd = fs * d

    def kernel(x_ref, w_ref, b_ref, o_ref, xs_ref):
        # x_ref : (ft, ht, fs*w, fs*d)  raw feats block (input dtype)
        # w_ref : (dim_in, dim_out)     bf16, VMEM-resident (fetched once)
        # b_ref : (1, dim_out)          f32,  VMEM-resident
        # o_ref : (ht*w, dim_out)       output block
        # xs_ref: (ht*w, dim_in)        bf16 scratch = rearranged activation
        #
        # Fused rearrange: for each (it, ih) the rearranged columns are the
        # contiguous slab x_ref[it, hh, ih*w:(ih+1)*w, :]; copy + cast to bf16.
        for it in range(ft):
            for ih in range(fs):
                c0 = (it * fs + ih) * fsd
                for hh in range(ht):
                    xs_ref[hh * w:(hh + 1) * w, c0:c0 + fsd] = (
                        x_ref[it, hh, ih * w:(ih + 1) * w, :].astype(jnp.bfloat16))

        bias = b_ref[...]                                   # (1, dim_out) f32
        for n0 in range(0, dim_out, _N_CHUNK):
            nc = min(_N_CHUNK, dim_out - n0)
            acc = None
            for k0 in range(0, dim_in, _K_CHUNK):
                kc = min(_K_CHUNK, dim_in - k0)
                part = jnp.dot(xs_ref[:, k0:k0 + kc],
                               w_ref[k0:k0 + kc, n0:n0 + nc],
                               preferred_element_type=jnp.float32)
                acc = part if acc is None else acc + part
            acc = acc + bias[:, n0:n0 + nc]
            o_ref[:, n0:n0 + nc] = acc.astype(o_ref.dtype)

    return kernel


@partial(jax.jit, static_argnames=("ft", "fs", "ht"))
def _residual_downsample_fwd(feats, w_eff, bias, *, ft, fs, ht):
    b, T, H, W, d = feats.shape
    t, h, w = T // ft, H // fs, W // fs
    fsd = fs * d
    dim_in, dim_out = w_eff.shape
    rows = ht * w
    assert dim_in == ft * fs * fsd and h % ht == 0

    # Free (order-preserving) reshape; no HBM traffic.
    feats4 = feats.reshape(b * t * ft, h, fs * w, fsd)
    out_dtype = feats.dtype

    in_isz = jnp.dtype(feats.dtype).itemsize
    out_isz = jnp.dtype(out_dtype).itemsize
    vmem_est = (2 * rows * dim_in * in_isz          # feats block (double-buffered)
                + 2 * dim_in * dim_out * 2          # resident bf16 weight (x2 safety)
                + 2 * dim_out * 4                   # bias
                + 2 * rows * dim_out * out_isz      # output block
                + rows * dim_in * 2)                # bf16 scratch
    vmem_limit = int(min(max(vmem_est + (4 << 20), 32 << 20), 100 << 20))

    out = pl.pallas_call(
        _make_kernel(ft, fs, ht, w, d, dim_in, dim_out),
        out_shape=jax.ShapeDtypeStruct((b * t, h * w, dim_out), out_dtype),
        grid=(b * t, h // ht),
        in_specs=[
            pl.BlockSpec((ft, ht, fs * w, fsd), lambda i, j: (i, j, 0, 0)),
            pl.BlockSpec((dim_in, dim_out), lambda i, j: (0, 0)),
            pl.BlockSpec((1, dim_out), lambda i, j: (0, 0)),
        ],
        out_specs=pl.BlockSpec((None, rows, dim_out), lambda i, j: (i, j, 0)),
        scratch_shapes=[pltpu.VMEM((rows, dim_in), jnp.bfloat16)],
        compiler_params=pltpu.CompilerParams(
            dimension_semantics=("parallel", "parallel"),
            vmem_limit_bytes=vmem_limit,
        ),
    )(feats4, w_eff, bias)

    return out.reshape(b, t, h, w, dim_out)


class ResidualDownsamplePallas:
    def __init__(self, dim, *, space=False, time=False, channel_reduce_factor=None):
        assert space or time
        self.space_factor = 2 if space else 1
        self.time_factor = 2 if time else 1
        self.channel_reduce_factor = (channel_reduce_factor
                                      if channel_reduce_factor is not None
                                      else self.space_factor)
        self.dim = dim
        factors = self.time_factor * self.space_factor ** 2
        assert factors % self.channel_reduce_factor == 0
        self.dim_in = dim * factors
        self.dim_out = self.dim_in // self.channel_reduce_factor

        # Grouped-mean residual as a (dim_in, dim_out) matrix R with 1/r entries,
        # so that  rearranged @ R == channel_reduced_residual  and the whole
        # forward collapses into a single GEMM + bias.
        r, d = self.channel_reduce_factor, dim
        fst = self.dim_in // (r * d)
        R = (jnp.eye(fst, dtype=jnp.float32)[:, None, None, :, None]
             * jnp.eye(d, dtype=jnp.float32)[None, None, :, None, :])
        R = jnp.broadcast_to(R, (fst, r, d, fst, d)) / r
        self._R = R.reshape(self.dim_in, self.dim_out)

        # PyTorch module zero-initialises the projection weight and bias.
        self.load_params(jnp.zeros((self.dim_out, self.dim_in), jnp.float32),
                         jnp.zeros((self.dim_out,), jnp.float32))

    def load_params(self, weight, bias):
        """weight: (dim_out, dim_in) torch Linear convention; bias: (dim_out,)."""
        assert weight.shape == (self.dim_out, self.dim_in)
        assert bias.shape == (self.dim_out,)
        self.weight = weight.astype(jnp.float32)
        self.bias = bias.astype(jnp.float32)
        # Effective GEMM weight (residual mean folded in), bf16 for the MXU.
        # NOTE: the residual path therefore rounds through bf16; keep f32 if an
        # exact mean is required.
        self.w_eff = (self.weight.T + self._R).astype(jnp.bfloat16)
        self.bias2 = self.bias.reshape(1, self.dim_out)

    def __call__(self, feats):
        b, T, H, W, d = feats.shape
        assert d == self.dim
        assert T % self.time_factor == 0
        assert H % self.space_factor == 0 and W % self.space_factor == 0
        ft, fs = self.time_factor, self.space_factor
        t, h, w = T // ft, H // fs, W // fs
        ht = _choose_row_tile(h, w, self.dim_in,
                              jnp.dtype(feats.dtype).itemsize, b * t)
        return _residual_downsample_fwd(feats, self.w_eff, self.bias2,
                                        ft=ft, fs=fs, ht=ht)


# ----------------------------------------------------------------------------
# Plain-JAX f32 reference (faithful to the PyTorch forward)
# ----------------------------------------------------------------------------
def _reference(feats, weight, bias, ft, fs, r):
    b, T, H, W, d = feats.shape
    t, h, w = T // ft, H // fs, W // fs
    dim_in = ft * fs * fs * d
    res = feats.reshape(b, t, ft, h, fs, w, fs, d)
    res = jnp.transpose(res, (0, 1, 3, 5, 2, 4, 6, 7)).reshape(b, t, h, w, dim_in)
    fst = dim_in // (r * d)
    reduced = res.reshape(b, t, h, w, fst, r, d).mean(axis=-2)
    reduced = reduced.reshape(b, t, h, w, dim_in // r)
    proj = res @ weight.T + bias
    return reduced + proj


if __name__ == "__main__":
    key = jax.random.PRNGKey(0)
    k_feats, k_w, k_b = jax.random.split(key, 3)

    b, vt, vh, vw, dim = 2, 8, 16, 16, 32
    feats = jax.random.normal(k_feats, (b, vt, vh, vw, dim), jnp.float32)

    model = ResidualDownsamplePallas(dim, space=True, time=True)

    # Load small random params so the GEMM path is genuinely exercised.
    weight = jax.random.normal(k_w, (model.dim_out, model.dim_in),
                               jnp.float32) / jnp.sqrt(model.dim_in)
    bias = 0.02 * jax.random.normal(k_b, (model.dim_out,), jnp.float32)
    model.load_params(weight, bias)

    out = jax.block_until_ready(model(feats))
    assert out.shape == (b, vt // 2, vh // 2, vw // 2, model.dim_out)

    ref = _reference(feats, weight, bias,
                     model.time_factor, model.space_factor,
                     model.channel_reduce_factor)
    # bf16 operands on the MXU -> loosened tolerance vs the f32 reference.
    assert jnp.allclose(out, ref, atol=5e-2, rtol=5e-2), \
        f"max abs err {jnp.max(jnp.abs(out - ref))}"

    # Faithful zero-init forward (projection contributes nothing; pure residual mean).
    model.load_params(jnp.zeros_like(weight), jnp.zeros_like(bias))
    out0 = jax.block_until_ready(model(feats))
    ref0 = _reference(feats, jnp.zeros_like(weight), jnp.zeros_like(bias),
                      model.time_factor, model.space_factor,
                      model.channel_reduce_factor)
    assert jnp.allclose(out0, ref0, atol=5e-2, rtol=5e-2)

    print("KERNEL_OK")
</pallas_src>

<mosaic_0001>
module attributes {stable_mosaic.version = 11 : i64} {
  func.func @kernel(%arg0: i32, %arg1: i32, %arg2: memref<2x8x16x64xf32, #tpu.memory_space<vmem>>, %arg3: memref<256x128xbf16, #tpu.memory_space<vmem>>, %arg4: memref<1x128xf32, #tpu.memory_space<vmem>>, %arg5: memref<1x64x128xf32, #tpu.memory_space<vmem>>, %arg6: memref<64x256xbf16, #tpu.memory_space<vmem>>) attributes {dimension_semantics = [#tpu.dimension_semantics<parallel>, #tpu.dimension_semantics<parallel>], iteration_bounds = array<i64: 8, 1>, scalar_prefetch = 0 : i64, scratch_operands = 1 : i64, tpu.core_type = #tpu.core_type<tc>, window_params = [{transform_indices = @transform_0, window_bounds = array<i64: 2, 8, 16, 64>}, {pipeline_mode = #tpu.pipeline_mode<synchronous>, transform_indices = @transform_1, window_bounds = array<i64: 256, 128>}, {pipeline_mode = #tpu.pipeline_mode<synchronous>, transform_indices = @transform_2, window_bounds = array<i64: 1, 128>}, {transform_indices = @transform_3, window_bounds = array<i64: 1, 64, 128>}]} {
    %c0 = arith.constant 0 : index
    %c0_0 = arith.constant 0 : index
    %c0_1 = arith.constant 0 : index
    %c0_2 = arith.constant 0 : index
    %0 = vector.load %arg2[%c0, %c0_0, %c0_1, %c0_2] : memref<2x8x16x64xf32, #tpu.memory_space<vmem>>, vector<1x1x8x64xf32>
    %1 = vector.shape_cast %0 : vector<1x1x8x64xf32> to vector<8x64xf32>
    %2 = arith.truncf %1 : vector<8x64xf32> to vector<8x64xbf16>
    %c0_3 = arith.constant 0 : index
    %c0_4 = arith.constant 0 : index
    %3 = vector.load %arg6[%c0_3, %c0_4] : memref<64x256xbf16, #tpu.memory_space<vmem>>, vector<8x64xbf16>
    tpu.vector_store %arg6[%c0_3, %c0_4], %2 {strides = array<i32>} : memref<64x256xbf16, #tpu.memory_space<vmem>>, vector<8x64xbf16>,
    %c0_5 = arith.constant 0 : index
    %c1 = arith.constant 1 : index
    %c0_6 = arith.constant 0 : index
    %c0_7 = arith.constant 0 : index
    %4 = vector.load %arg2[%c0_5, %c1, %c0_6, %c0_7] : memref<2x8x16x64xf32, #tpu.memory_space<vmem>>, vector<1x1x8x64xf32>
    %5 = vector.shape_cast %4 : vector<1x1x8x64xf32> to vector<8x64xf32>
    %6 = arith.truncf %5 : vector<8x64xf32> to vector<8x64xbf16>
    %c8 = arith.constant 8 : index
    %c0_8 = arith.constant 0 : index
    %7 = vector.load %arg6[%c8, %c0_8] : memref<64x256xbf16, #tpu.memory_space<vmem>>, vector<8x64xbf16>
    tpu.vector_store %arg6[%c8, %c0_8], %6 {strides = array<i32>} : memref<64x256xbf16, #tpu.memory_space<vmem>>, vector<8x64xbf16>,
    %c0_9 = arith.constant 0 : index
    %c2 = arith.constant 2 : index
    %c0_10 = arith.constant 0 : index
    %c0_11 = arith.constant 0 : index
    %8 = vector.load %arg2[%c0_9, %c2, %c0_10, %c0_11] : memref<2x8x16x64xf32, #tpu.memory_space<vmem>>, vector<1x1x8x64xf32>
    %9 = vector.shape_cast %8 : vector<1x1x8x64xf32> to vector<8x64xf32>
    %10 = arith.truncf %9 : vector<8x64xf32> to vector<8x64xbf16>
    %c16 = arith.constant 16 : index
    %c0_12 = arith.constant 0 : index
    %11 = vector.load %arg6[%c16, %c0_12] : memref<64x256xbf16, #tpu.memory_space<vmem>>, vector<8x64xbf16>
    tpu.vector_store %arg6[%c16, %c0_12], %10 {strides = array<i32>} : memref<64x256xbf16, #tpu.memory_space<vmem>>, vector<8x64xbf16>,
    %c0_13 = arith.constant 0 : index
    %c3 = arith.constant 3 : index
    %c0_14 = arith.constant 0 : index
    %c0_15 = arith.constant 0 : index
    %12 = vector.load %arg2[%c0_13, %c3, %c0_14, %c0_15] : memref<2x8x16x64xf32, #tpu.memory_space<vmem>>, vector<1x1x8x64xf32>
    %13 = vector.shape_cast %12 : vector<1x1x8x64xf32> to vector<8x64xf32>
    %14 = arith.truncf %13 : vector<8x64xf32> to vector<8x64xbf16>
    %c24 = arith.constant 24 : index
    %c0_16 = arith.constant 0 : index
    %15 = vector.load %arg6[%c24, %c0_16] : memref<64x256xbf16, #tpu.memory_space<vmem>>, vector<8x64xbf16>
    tpu.vector_store %arg6[%c24, %c0_16], %14 {strides = array<i32>} : memref<64x256xbf16, #tpu.memory_space<vmem>>, vector<8x64xbf16>,
    %c0_17 = arith.constant 0 : index
    %c4 = arith.constant 4 : index
    %c0_18 = arith.constant 0 : index
    %c0_19 = arith.constant 0 : index
    %16 = vector.load %arg2[%c0_17, %c4, %c0_18, %c0_19] : memref<2x8x16x64xf32, #tpu.memory_space<vmem>>, vector<1x1x8x64xf32>
    %17 = vector.shape_cast %16 : vector<1x1x8x64xf32> to vector<8x64xf32>
    %18 = arith.truncf %17 : vector<8x64xf32> to vector<8x64xbf16>
    %c32 = arith.constant 32 : index
    %c0_20 = arith.constant 0 : index
    %19 = vector.load %arg6[%c32, %c0_20] : memref<64x256xbf16, #tpu.memory_space<vmem>>, vector<8x64xbf16>
    tpu.vector_store %arg6[%c32, %c0_20], %18 {strides = array<i32>} : memref<64x256xbf16, #tpu.memory_space<vmem>>, vector<8x64xbf16>,
    %c0_21 = arith.constant 0 : index
    %c5 = arith.constant 5 : index
    %c0_22 = arith.constant 0 : index
    %c0_23 = arith.constant 0 : index
    %20 = vector.load %arg2[%c0_21, %c5, %c0_22, %c0_23] : memref<2x8x16x64xf32, #tpu.memory_space<vmem>>, vector<1x1x8x64xf32>
    %21 = vector.shape_cast %20 : vector<1x1x8x64xf32> to vector<8x64xf32>
    %22 = arith.truncf %21 : vector<8x64xf32> to vector<8x64xbf16>
    %c40 = arith.constant 40 : index
    %c0_24 = arith.constant 0 : index
    %23 = vector.load %arg6[%c40, %c0_24] : memref<64x256xbf16, #tpu.memory_space<vmem>>, vector<8x64xbf16>
    tpu.vector_store %arg6[%c40, %c0_24], %22 {strides = array<i32>} : memref<64x256xbf16, #tpu.memory_space<vmem>>, vector<8x64xbf16>,
    %c0_25 = arith.constant 0 : index
    %c6 = arith.constant 6 : index
    %c0_26 = arith.constant 0 : index
    %c0_27 = arith.constant 0 : index
    %24 = vector.load %arg2[%c0_25, %c6, %c0_26, %c0_27] : memref<2x8x16x64xf32, #tpu.memory_space<vmem>>, vector<1x1x8x64xf32>
    %25 = vector.shape_cast %24 : vector<1x1x8x64xf32> to vector<8x64xf32>
    %26 = arith.truncf %25 : vector<8x64xf32> to vector<8x64xbf16>
    %c48 = arith.constant 48 : index
    %c0_28 = arith.constant 0 : index
    %27 = vector.load %arg6[%c48, %c0_28] : memref<64x256xbf16, #tpu.memory_space<vmem>>, vector<8x64xbf16>
    tpu.vector_store %arg6[%c48, %c0_28], %26 {strides = array<i32>} : memref<64x256xbf16, #tpu.memory_space<vmem>>, vector<8x64xbf16>,
    %c0_29 = arith.constant 0 : index
    %c7 = arith.constant 7 : index
    %c0_30 = arith.constant 0 : index
    %c0_31 = arith.constant 0 : index
    %28 = vector.load %arg2[%c0_29, %c7, %c0_30, %c0_31] : memref<2x8x16x64xf32, #tpu.memory_space<vmem>>, vector<1x1x8x64xf32>
    %29 = vector.shape_cast %28 : vector<1x1x8x64xf32> to vector<8x64xf32>
    %30 = arith.truncf %29 : vector<8x64xf32> to vector<8x64xbf16>
    %c56 = arith.constant 56 : index
    %c0_32 = arith.constant 0 : index
    %31 = vector.load %arg6[%c56, %c0_32] : memref<64x256xbf16, #tpu.memory_space<vmem>>, vector<8x64xbf16>
    tpu.vector_store %arg6[%c56, %c0_32], %30 {strides = array<i32>} : memref<64x256xbf16, #tpu.memory_space<vmem>>, vector<8x64xbf16>,
    %c0_33 = arith.constant 0 : index
    %c0_34 = arith.constant 0 : index
    %c8_35 = arith.constant 8 : index
    %c0_36 = arith.constant 0 : index
    %32 = vector.load %arg2[%c0_33, %c0_34, %c8_35, %c0_36] : memref<2x8x16x64xf32, #tpu.memory_space<vmem>>, vector<1x1x8x64xf32>
    %33 = vector.shape_cast %32 : vector<1x1x8x64xf32> to vector<8x64xf32>
    %34 = arith.truncf %33 : vector<8x64xf32> to vector<8x64xbf16>
    %c0_37 = arith.constant 0 : index
    %c64 = arith.constant 64 : index
    %35 = vector.load %arg6[%c0_37, %c64] : memref<64x256xbf16, #tpu.memory_space<vmem>>, vector<8x64xbf16>
    tpu.vector_store %arg6[%c0_37, %c64], %34 {strides = array<i32>} : memref<64x256xbf16, #tpu.memory_space<vmem>>, vector<8x64xbf16>,
    %c0_38 = arith.constant 0 : index
    %c1_39 = arith.constant 1 : index
    %c8_40 = arith.constant 8 : index
    %c0_41 = arith.constant 0 : index
    %36 = vector.load %arg2[%c0_38, %c1_39, %c8_40, %c0_41] : memref<2x8x16x64xf32, #tpu.memory_space<vmem>>, vector<1x1x8x64xf32>
    %37 = vector.shape_cast %36 : vector<1x1x8x64xf32> to vector<8x64xf32>
    %38 = arith.truncf %37 : vector<8x64xf32> to vector<8x64xbf16>
    %c8_42 = arith.constant 8 : index
    %c64_43 = arith.constant 64 : index
    %39 = vector.load %arg6[%c8_42, %c64_43] : memref<64x256xbf16, #tpu.memory_space<vmem>>, vector<8x64xbf16>
    tpu.vector_store %arg6[%c8_42, %c64_43], %38 {strides = array<i32>} : memref<64x256xbf16, #tpu.memory_space<vmem>>, vector<8x64xbf16>,
    %c0_44 = arith.constant 0 : index
    %c2_45 = arith.constant 2 : index
    %c8_46 = arith.constant 8 : index
    %c0_47 = arith.constant 0 : index
    %40 = vector.load %arg2[%c0_44, %c2_45, %c8_46, %c0_47] : memref<2x8x16x64xf32, #tpu.memory_space<vmem>>, vector<1x1x8x64xf32>
    %41 = vector.shape_cast %40 : vector<1x1x8x64xf32> to vector<8x64xf32>
    %42 = arith.truncf %41 : vector<8x64xf32> to vector<8x64xbf16>
    %c16_48 = arith.constant 16 : index
    %c64_49 = arith.constant 64 : index
    %43 = vector.load %arg6[%c16_48, %c64_49] : memref<64x256xbf16, #tpu.memory_space<vmem>>, vector<8x64xbf16>
    tpu.vector_store %arg6[%c16_48, %c64_49], %42 {strides = array<i32>} : memref<64x256xbf16, #tpu.memory_space<vmem>>, vector<8x64xbf16>,
    %c0_50 = arith.constant 0 : index
    %c3_51 = arith.constant 3 : index
    %c8_52 = arith.constant 8 : index
    %c0_53 = arith.constant 0 : index
    %44 = vector.load %arg2[%c0_50, %c3_51, %c8_52, %c0_53] : memref<2x8x16x64xf32, #tpu.memory_space<vmem>>, vector<1x1x8x64xf32>
    %45 = vector.shape_cast %44 : vector<1x1x8x64xf32> to vector<8x64xf32>
    %46 = arith.truncf %45 : vector<8x64xf32> to vector<8x64xbf16>
    %c24_54 = arith.constant 24 : index
    %c64_55 = arith.constant 64 : index
    %47 = vector.load %arg6[%c24_54, %c64_55] : memref<64x256xbf16, #tpu.memory_space<vmem>>, vector<8x64xbf16>
    tpu.vector_store %arg6[%c24_54, %c64_55], %46 {strides = array<i32>} : memref<64x256xbf16, #tpu.memory_space<vmem>>, vector<8x64xbf16>,
    %c0_56 = arith.constant 0 : index
    %c4_57 = arith.constant 4 : index
    %c8_58 = arith.constant 8 : index
    %c0_59 = arith.constant 0 : index
    %48 = vector.load %arg2[%c0_56, %c4_57, %c8_58, %c0_59] : memref<2x8x16x64xf32, #tpu.memory_space<vmem>>, vector<1x1x8x64xf32>
    %49 = vector.shape_cast %48 : vector<1x1x8x64xf32> to vector<8x64xf32>
    %50 = arith.truncf %49 : vector<8x64xf32> to vector<8x64xbf16>
    %c32_60 = arith.constant 32 : index
    %c64_61 = arith.constant 64 : index
    %51 = vector.load %arg6[%c32_60, %c64_61] : memref<64x256xbf16, #tpu.memory_space<vmem>>, vector<8x64xbf16>
    tpu.vector_store %arg6[%c32_60, %c64_61], %50 {strides = array<i32>} : memref<64x256xbf16, #tpu.memory_space<vmem>>, vector<8x64xbf16>,
    %c0_62 = arith.constant 0 : index
    %c5_63 = arith.constant 5 : index
    %c8_64 = arith.constant 8 : index
    %c0_65 = arith.constant 0 : index
    %52 = vector.load %arg2[%c0_62, %c5_63, %c8_64, %c0_65] : memref<2x8x16x64xf32, #tpu.memory_space<vmem>>, vector<1x1x8x64xf32>
    %53 = vector.shape_cast %52 : vector<1x1x8x64xf32> to vector<8x64xf32>
    %54 = arith.truncf %53 : vector<8x64xf32> to vector<8x64xbf16>
    %c40_66 = arith.constant 40 : index
    %c64_67 = arith.constant 64 : index
    %55 = vector.load %arg6[%c40_66, %c64_67] : memref<64x256xbf16, #tpu.memory_space<vmem>>, vector<8x64xbf16>
    tpu.vector_store %arg6[%c40_66, %c64_67], %54 {strides = array<i32>} : memref<64x256xbf16, #tpu.memory_space<vmem>>, vector<8x64xbf16>,
    %c0_68 = arith.constant 0 : index
    %c6_69 = arith.constant 6 : index
    %c8_70 = arith.constant 8 : index
    %c0_71 = arith.constant 0 : index
    %56 = vector.load %arg2[%c0_68, %c6_69, %c8_70, %c0_71] : memref<2x8x16x64xf32, #tpu.memory_space<vmem>>, vector<1x1x8x64xf32>
    %57 = vector.shape_cast %56 : vector<1x1x8x64xf32> to vector<8x64xf32>
    %58 = arith.truncf %57 : vector<8x64xf32> to vector<8x64xbf16>
    %c48_72 = arith.constant 48 : index
    %c64_73 = arith.constant 64 : index
    %59 = vector.load %arg6[%c48_72, %c64_73] : memref<64x256xbf16, #tpu.memory_space<vmem>>, vector<8x64xbf16>
    tpu.vector_store %arg6[%c48_72, %c64_73], %58 {strides = array<i32>} : memref<64x256xbf16, #tpu.memory_space<vmem>>, vector<8x64xbf16>,
    %c0_74 = arith.constant 0 : index
    %c7_75 = arith.constant 7 : index
    %c8_76 = arith.constant 8 : index
    %c0_77 = arith.constant 0 : index
    %60 = vector.load %arg2[%c0_74, %c7_75, %c8_76, %c0_77] : memref<2x8x16x64xf32, #tpu.memory_space<vmem>>, vector<1x1x8x64xf32>
    %61 = vector.shape_cast %60 : vector<1x1x8x64xf32> to vector<8x64xf32>
    %62 = arith.truncf %61 : vector<8x64xf32> to vector<8x64xbf16>
    %c56_78 = arith.constant 56 : index
    %c64_79 = arith.constant 64 : index
    %63 = vector.load %arg6[%c56_78, %c64_79] : memref<64x256xbf16, #tpu.memory_space<vmem>>, vector<8x64xbf16>
    tpu.vector_store %arg6[%c56_78, %c64_79], %62 {strides = array<i32>} : memref<64x256xbf16, #tpu.memory_space<vmem>>, vector<8x64xbf16>,
    %c1_80 = arith.constant 1 : index
    %c0_81 = arith.constant 0 : index
    %c0_82 = arith.constant 0 : index
    %c0_83 = arith.constant 0 : index
    %64 = vector.load %arg2[%c1_80, %c0_81, %c0_82, %c0_83] : memref<2x8x16x64xf32, #tpu.memory_space<vmem>>, vector<1x1x8x64xf32>
    %65 = vector.shape_cast %64 : vector<1x1x8x64xf32> to vector<8x64xf32>
    %66 = arith.truncf %65 : vector<8x64xf32> to vector<8x64xbf16>
    %c0_84 = arith.constant 0 : index
    %c128 = arith.constant 128 : index
    %67 = vector.load %arg6[%c0_84, %c128] : memref<64x256xbf16, #tpu.memory_space<vmem>>, vector<8x64xbf16>
    tpu.vector_store %arg6[%c0_84, %c128], %66 {strides = array<i32>} : memref<64x256xbf16, #tpu.memory_space<vmem>>, vector<8x64xbf16>,
    %c1_85 = arith.constant 1 : index
    %c1_86 = arith.constant 1 : index
    %c0_87 = arith.constant 0 : index
    %c0_88 = arith.constant 0 : index
    %68 = vector.load %arg2[%c1_85, %c1_86, %c0_87, %c0_88] : memref<2x8x16x64xf32, #tpu.memory_space<vmem>>, vector<1x1x8x64xf32>
    %69 = vector.shape_cast %68 : vector<1x1x8x64xf32> to vector<8x64xf32>
    %70 = arith.truncf %69 : vector<8x64xf32> to vector<8x64xbf16>
    %c8_89 = arith.constant 8 : index
    %c128_90 = arith.constant 128 : index
    %71 = vector.load %arg6[%c8_89, %c128_90] : memref<64x256xbf16, #tpu.memory_space<vmem>>, vector<8x64xbf16>
    tpu.vector_store %arg6[%c8_89, %c128_90], %70 {strides = array<i32>} : memref<64x256xbf16, #tpu.memory_space<vmem>>, vector<8x64xbf16>,
    %c1_91 = arith.constant 1 : index
    %c2_92 = arith.constant 2 : index
    %c0_93 = arith.constant 0 : index
    %c0_94 = arith.constant 0 : index
    %72 = vector.load %arg2[%c1_91, %c2_92, %c0_93, %c0_94] : memref<2x8x16x64xf32, #tpu.memory_space<vmem>>, vector<1x1x8x64xf32>
    %73 = vector.shape_cast %72 : vector<1x1x8x64xf32> to vector<8x64xf32>
    %74 = arith.truncf %73 : vector<8x64xf32> to vector<8x64xbf16>
    %c16_95 = arith.constant 16 : index
    %c128_96 = arith.constant 128 : index
    %75 = vector.load %arg6[%c16_95, %c128_96] : memref<64x256xbf16, #tpu.memory_space<vmem>>, vector<8x64xbf16>
    tpu.vector_store %arg6[%c16_95, %c128_96], %74 {strides = array<i32>} : memref<64x256xbf16, #tpu.memory_space<vmem>>, vector<8x64xbf16>,
    %c1_97 = arith.constant 1 : index
    %c3_98 = arith.constant 3 : index
    %c0_99 = arith.constant 0 : index
    %c0_100 = arith.constant 0 : index
    %76 = vector.load %arg2[%c1_97, %c3_98, %c0_99, %c0_100] : memref<2x8x16x64xf32, #tpu.memory_space<vmem>>, vector<1x1x8x64xf32>
    %77 = vector.shape_cast %76 : vector<1x1x8x64xf32> to vector<8x64xf32>
    %78 = arith.truncf %77 : vector<8x64xf32> to vector<8x64xbf16>
    %c24_101 = arith.constant 24 : index
    %c128_102 = arith.constant 128 : index
    %79 = vector.load %arg6[%c24_101, %c128_102] : memref<64x256xbf16, #tpu.memory_space<vmem>>, vector<8x64xbf16>
    tpu.vector_store %arg6[%c24_101, %c128_102], %78 {strides = array<i32>} : memref<64x256xbf16, #tpu.memory_space<vmem>>, vector<8x64xbf16>,
    %c1_103 = arith.constant 1 : index
    %c4_104 = arith.constant 4 : index
    %c0_105 = arith.constant 0 : index
    %c0_106 = arith.constant 0 : index
    %80 = vector.load %arg2[%c1_103, %c4_104, %c0_105, %c0_106] : memref<2x8x16x64xf32, #tpu.memory_space<vmem>>, vector<1x1x8x64xf32>
    %81 = vector.shape_cast %80 : vector<1x1x8x64xf32> to vector<8x64xf32>
    %82 = arith.truncf %81 : vector<8x64xf32> to vector<8x64xbf16>
    %c32_107 = arith.constant 32 : index
    %c128_108 = arith.constant 128 : index
    %83 = vector.load %arg6[%c32_107, %c128_108] : memref<64x256xbf16, #tpu.memory_space<vmem>>, vector<8x64xbf16>
    tpu.vector_store %arg6[%c32_107, %c128_108], %82 {strides = array<i32>} : memref<64x256xbf16, #tpu.memory_space<vmem>>, vector<8x64xbf16>,
    %c1_109 = arith.constant 1 : index
    %c5_110 = arith.constant 5 : index
    %c0_111 = arith.constant 0 : index
    %c0_112 = arith.constant 0 : index
    %84 = vector.load %arg2[%c1_109, %c5_110, %c0_111, %c0_112] : memref<2x8x16x64xf32, #tpu.memory_space<vmem>>, vector<1x1x8x64xf32>
    %85 = vector.shape_cast %84 : vector<1x1x8x64xf32> to vector<8x64xf32>
    %86 = arith.truncf %85 : vector<8x64xf32> to vector<8x64xbf16>
    %c40_113 = arith.constant 40 : index
    %c128_114 = arith.constant 128 : index
    %87 = vector.load %arg6[%c40_113, %c128_114] : memref<64x256xbf16, #tpu.memory_space<vmem>>, vector<8x64xbf16>
    tpu.vector_store %arg6[%c40_113, %c128_114], %86 {strides = array<i32>} : memref<64x256xbf16, #tpu.memory_space<vmem>>, vector<8x64xbf16>,
    %c1_115 = arith.constant 1 : index
    %c6_116 = arith.constant 6 : index
    %c0_117 = arith.constant 0 : index
    %c0_118 = arith.constant 0 : index
    %88 = vector.load %arg2[%c1_115, %c6_116, %c0_117, %c0_118] : memref<2x8x16x64xf32, #tpu.memory_space<vmem>>, vector<1x1x8x64xf32>
    %89 = vector.shape_cast %88 : vector<1x1x8x64xf32> to vector<8x64xf32>
    %90 = arith.truncf %89 : vector<8x64xf32> to vector<8x64xbf16>
    %c48_119 = arith.constant 48 : index
    %c128_120 = arith.constant 128 : index
    %91 = vector.load %arg6[%c48_119, %c128_120] : memref<64x256xbf16, #tpu.memory_space<vmem>>, vector<8x64xbf16>
    tpu.vector_store %arg6[%c48_119, %c128_120], %90 {strides = array<i32>} : memref<64x256xbf16, #tpu.memory_space<vmem>>, vector<8x64xbf16>,
    %c1_121 = arith.constant 1 : index
    %c7_122 = arith.constant 7 : index
    %c0_123 = arith.constant 0 : index
    %c0_124 = arith.constant 0 : index
    %92 = vector.load %arg2[%c1_121, %c7_122, %c0_123, %c0_124] : memref<2x8x16x64xf32, #tpu.memory_space<vmem>>, vector<1x1x8x64xf32>
    %93 = vector.shape_cast %92 : vector<1x1x8x64xf32> to vector<8x64xf32>
    %94 = arith.truncf %93 : vector<8x64xf32> to vector<8x64xbf16>
    %c56_125 = arith.constant 56 : index
    %c128_126 = arith.constant 128 : index
    %95 = vector.load %arg6[%c56_125, %c128_126] : memref<64x256xbf16, #tpu.memory_space<vmem>>, vector<8x64xbf16>
    tpu.vector_store %arg6[%c56_125, %c128_126], %94 {strides = array<i32>} : memref<64x256xbf16, #tpu.memory_space<vmem>>, vector<8x64xbf16>,
    %c1_127 = arith.constant 1 : index
    %c0_128 = arith.constant 0 : index
    %c8_129 = arith.constant 8 : index
    %c0_130 = arith.constant 0 : index
    %96 = vector.load %arg2[%c1_127, %c0_128, %c8_129, %c0_130] : memref<2x8x16x64xf32, #tpu.memory_space<vmem>>, vector<1x1x8x64xf32>
    %97 = vector.shape_cast %96 : vector<1x1x8x64xf32> to vector<8x64xf32>
    %98 = arith.truncf %97 : vector<8x64xf32> to vector<8x64xbf16>
    %c0_131 = arith.constant 0 : index
    %c192 = arith.constant 192 : index
    %99 = vector.load %arg6[%c0_131, %c192] : memref<64x256xbf16, #tpu.memory_space<vmem>>, vector<8x64xbf16>
    tpu.vector_store %arg6[%c0_131, %c192], %98 {strides = array<i32>} : memref<64x256xbf16, #tpu.memory_space<vmem>>, vector<8x64xbf16>,
    %c1_132 = arith.constant 1 : index
    %c1_133 = arith.constant 1 : index
    %c8_134 = arith.constant 8 : index
    %c0_135 = arith.constant 0 : index
    %100 = vector.load %arg2[%c1_132, %c1_133, %c8_134, %c0_135] : memref<2x8x16x64xf32, #tpu.memory_space<vmem>>, vector<1x1x8x64xf32>
    %101 = vector.shape_cast %100 : vector<1x1x8x64xf32> to vector<8x64xf32>
    %102 = arith.truncf %101 : vector<8x64xf32> to vector<8x64xbf16>
    %c8_136 = arith.constant 8 : index
    %c192_137 = arith.constant 192 : index
    %103 = vector.load %arg6[%c8_136, %c192_137] : memref<64x256xbf16, #tpu.memory_space<vmem>>, vector<8x64xbf16>
    tpu.vector_store %arg6[%c8_136, %c192_137], %102 {strides = array<i32>} : memref<64x256xbf16, #tpu.memory_space<vmem>>, vector<8x64xbf16>,
    %c1_138 = arith.constant 1 : index
    %c2_139 = arith.constant 2 : index
    %c8_140 = arith.constant 8 : index
    %c0_141 = arith.constant 0 : index
    %104 = vector.load %arg2[%c1_138, %c2_139, %c8_140, %c0_141] : memref<2x8x16x64xf32, #tpu.memory_space<vmem>>, vector<1x1x8x64xf32>
    %105 = vector.shape_cast %104 : vector<1x1x8x64xf32> to vector<8x64xf32>
    %106 = arith.truncf %105 : vector<8x64xf32> to vector<8x64xbf16>
    %c16_142 = arith.constant 16 : index
    %c192_143 = arith.constant 192 : index
    %107 = vector.load %arg6[%c16_142, %c192_143] : memref<64x256xbf16, #tpu.memory_space<vmem>>, vector<8x64xbf16>
    tpu.vector_store %arg6[%c16_142, %c192_143], %106 {strides = array<i32>} : memref<64x256xbf16, #tpu.memory_space<vmem>>, vector<8x64xbf16>,
    %c1_144 = arith.constant 1 : index
    %c3_145 = arith.constant 3 : index
    %c8_146 = arith.constant 8 : index
    %c0_147 = arith.constant 0 : index
    %108 = vector.load %arg2[%c1_144, %c3_145, %c8_146, %c0_147] : memref<2x8x16x64xf32, #tpu.memory_space<vmem>>, vector<1x1x8x64xf32>
    %109 = vector.shape_cast %108 : vector<1x1x8x64xf32> to vector<8x64xf32>
    %110 = arith.truncf %109 : vector<8x64xf32> to vector<8x64xbf16>
    %c24_148 = arith.constant 24 : index
    %c192_149 = arith.constant 192 : index
    %111 = vector.load %arg6[%c24_148, %c192_149] : memref<64x256xbf16, #tpu.memory_space<vmem>>, vector<8x64xbf16>
    tpu.vector_store %arg6[%c24_148, %c192_149], %110 {strides = array<i32>} : memref<64x256xbf16, #tpu.memory_space<vmem>>, vector<8x64xbf16>,
    %c1_150 = arith.constant 1 : index
    %c4_151 = arith.constant 4 : index
    %c8_152 = arith.constant 8 : index
    %c0_153 = arith.constant 0 : index
    %112 = vector.load %arg2[%c1_150, %c4_151, %c8_152, %c0_153] : memref<2x8x16x64xf32, #tpu.memory_space<vmem>>, vector<1x1x8x64xf32>
    %113 = vector.shape_cast %112 : vector<1x1x8x64xf32> to vector<8x64xf32>
    %114 = arith.truncf %113 : vector<8x64xf32> to vector<8x64xbf16>
    %c32_154 = arith.constant 32 : index
    %c192_155 = arith.constant 192 : index
    %115 = vector.load %arg6[%c32_154, %c192_155] : memref<64x256xbf16, #tpu.memory_space<vmem>>, vector<8x64xbf16>
    tpu.vector_store %arg6[%c32_154, %c192_155], %114 {strides = array<i32>} : memref<64x256xbf16, #tpu.memory_space<vmem>>, vector<8x64xbf16>,
    %c1_156 = arith.constant 1 : index
    %c5_157 = arith.constant 5 : index
    %c8_158 = arith.constant 8 : index
    %c0_159 = arith.constant 0 : index
    %116 = vector.load %arg2[%c1_156, %c5_157, %c8_158, %c0_159] : memref<2x8x16x64xf32, #tpu.memory_space<vmem>>, vector<1x1x8x64xf32>
    %117 = vector.shape_cast %116 : vector<1x1x8x64xf32> to vector<8x64xf32>
    %118 = arith.truncf %117 : vector<8x64xf32> to vector<8x64xbf16>
    %c40_160 = arith.constant 40 : index
    %c192_161 = arith.constant 192 : index
    %119 = vector.load %arg6[%c40_160, %c192_161] : memref<64x256xbf16, #tpu.memory_space<vmem>>, vector<8x64xbf16>
    tpu.vector_store %arg6[%c40_160, %c192_161], %118 {strides = array<i32>} : memref<64x256xbf16, #tpu.memory_space<vmem>>, vector<8x64xbf16>,
    %c1_162 = arith.constant 1 : index
    %c6_163 = arith.constant 6 : index
    %c8_164 = arith.constant 8 : index
    %c0_165 = arith.constant 0 : index
    %120 = vector.load %arg2[%c1_162, %c6_163, %c8_164, %c0_165] : memref<2x8x16x64xf32, #tpu.memory_space<vmem>>, vector<1x1x8x64xf32>
    %121 = vector.shape_cast %120 : vector<1x1x8x64xf32> to vector<8x64xf32>
    %122 = arith.truncf %121 : vector<8x64xf32> to vector<8x64xbf16>
    %c48_166 = arith.constant 48 : index
    %c192_167 = arith.constant 192 : index
    %123 = vector.load %arg6[%c48_166, %c192_167] : memref<64x256xbf16, #tpu.memory_space<vmem>>, vector<8x64xbf16>
    tpu.vector_store %arg6[%c48_166, %c192_167], %122 {strides = array<i32>} : memref<64x256xbf16, #tpu.memory_space<vmem>>, vector<8x64xbf16>,
    %c1_168 = arith.constant 1 : index
    %c7_169 = arith.constant 7 : index
    %c8_170 = arith.constant 8 : index
    %c0_171 = arith.constant 0 : index
    %124 = vector.load %arg2[%c1_168, %c7_169, %c8_170, %c0_171] : memref<2x8x16x64xf32, #tpu.memory_space<vmem>>, vector<1x1x8x64xf32>
    %125 = vector.shape_cast %124 : vector<1x1x8x64xf32> to vector<8x64xf32>
    %126 = arith.truncf %125 : vector<8x64xf32> to vector<8x64xbf16>
    %c56_172 = arith.constant 56 : index
    %c192_173 = arith.constant 192 : index
    %127 = vector.load %arg6[%c56_172, %c192_173] : memref<64x256xbf16, #tpu.memory_space<vmem>>, vector<8x64xbf16>
    tpu.vector_store %arg6[%c56_172, %c192_173], %126 {strides = array<i32>} : memref<64x256xbf16, #tpu.memory_space<vmem>>, vector<8x64xbf16>,
    %c0_174 = arith.constant 0 : index
    %c0_175 = arith.constant 0 : index
    %128 = vector.load %arg4[%c0_174, %c0_175] : memref<1x128xf32, #tpu.memory_space<vmem>>, vector<1x128xf32>
    %c0_176 = arith.constant 0 : index
    %c0_177 = arith.constant 0 : index
    %129 = vector.load %arg6[%c0_176, %c0_177] : memref<64x256xbf16, #tpu.memory_space<vmem>>, vector<64x256xbf16>
    %c0_178 = arith.constant 0 : index
    %c0_179 = arith.constant 0 : index
    %130 = vector.load %arg3[%c0_178, %c0_179] : memref<256x128xbf16, #tpu.memory_space<vmem>>, vector<256x128xbf16>
    %cst = arith.constant dense<0.000000e+00> : vector<64x128xf32>
    %131 = tpu.matmul %129, %130, %cst {dimension_numbers = #tpu.dot_dimension_numbers<[1], [0], [0], [1], [0, 0, 1, 1], [], []>} : vector<64x256xbf16>, vector<256x128xbf16>, vector<64x128xf32> -> vector<64x128xf32>
    %132 = vector.broadcast %128 : vector<1x128xf32> to vector<64x128xf32>
    %133 = arith.addf %131, %132 : vector<64x128xf32>
    %c0_180 = arith.constant 0 : index
    %c0_181 = arith.constant 0 : index
    %c0_182 = arith.constant 0 : index
    %134 = vector.load %arg5[%c0_180, %c0_181, %c0_182] : memref<1x64x128xf32, #tpu.memory_space<vmem>>, vector<1x64x128xf32>
    %135 = vector.shape_cast %134 : vector<1x64x128xf32> to vector<64x128xf32>
    %136 = vector.shape_cast %133 : vector<64x128xf32> to vector<1x64x128xf32>
    tpu.vector_store %arg5[%c0_180, %c0_181, %c0_182], %136 {strides = array<i32>} : memref<1x64x128xf32, #tpu.memory_space<vmem>>, vector<1x64x128xf32>,
    return
  }
  func.func @transform_0(%arg0: i32, %arg1: i32) -> (i32, i32, i32, i32) {
    %c0_i32 = arith.constant 0 : i32
    %c0_i32_0 = arith.constant 0 : i32
    %c0_i32_1 = arith.constant 0 : i32
    return %arg0, %arg1, %c0_i32, %c0_i32_0 : i32, i32, i32, i32
  }
  func.func @transform_1(%arg0: i32, %arg1: i32) -> (i32, i32) {
    %c0_i32 = arith.constant 0 : i32
    %c0_i32_0 = arith.constant 0 : i32
    %c0_i32_1 = arith.constant 0 : i32
    return %c0_i32, %c0_i32_0 : i32, i32
  }
  func.func @transform_2(%arg0: i32, %arg1: i32) -> (i32, i32) {
    %c0_i32 = arith.constant 0 : i32
    %c0_i32_0 = arith.constant 0 : i32
    %c0_i32_1 = arith.constant 0 : i32
    return %c0_i32, %c0_i32_0 : i32, i32
  }
  func.func @transform_3(%arg0: i32, %arg1: i32) -> (i32, i32, i32) {
    %c0_i32 = arith.constant 0 : i32
    %c0_i32_0 = arith.constant 0 : i32
    return %arg0, %arg1, %c0_i32 : i32, i32, i32
  }
}

</mosaic_0001>

<bundles_post_ra>
// kernel: _residual_downsample_fwd.1
= control target key start
LH: loop header
LB: loop body
LE: loop exit
PB: predicated region body
PF: predicated region fallthrough
CT: control target
= control target key end

     0   :  { %8 = vsyncpa [#allocation4], 0  ;;  %s1319_s0 = inlined_call_operand.vmem [shape: f32[16,8,16,64], index: 0, kind: input, shape index: {}]   ;;  %s1320_s1 = inlined_call_operand.vmem [shape: bf16[256,128], index: 1, kind: input, shape index: {}]   ;;  %s1321_s2 = inlined_call_operand.vmem [shape: f32[1,128], index: 2, kind: input, shape index: {}]   ;;  %s1322_s3 = inlined_call_operand.hbm [shape: f32[8,64,128], index: 3, kind: output, shape index: {}]  }
   0x1   :  { %10 = vsyncpa [#allocation4 + $0x1], 0  ;;  %s1075_s12 = smov 0   ;;  %s1077_s13 = smov 0  }
   0x2   :  { %s1079_s14 = smov 0   ;;  %s1081_s15 = smov 0  }
   0x3   :  { %s1083_s16 = smov 0   ;;  %s1085_s17 = smov 0  }
   0x4 LB: > { %s731_s18 = sadd.s32 4294967295, %s1050_s17   ;;  %s732_s19 = sadd.s32 4294967294, %s1050_s17   ;;  %s1050_s17 = sphi %s1085_s17, %s16_s17   ;;  %s1046_s16 = sphi %s1083_s16, %s1329_s16   ;;  %s1042_s15 = sphi %s1081_s15, %s1328_s15   ;;  %s1038_s14 = sphi %s1079_s14, %s1327_s14   ;;  %s1034_s13 = sphi %s1077_s13, %s1326_s13   ;;  %s1030_s12 = sphi %s1075_s12, %s1325_s12  }
   0x5   : > { %s28_s20 = sadd.s32 1, %s1046_s16  ;;  %s107_s21 = sadd.s32 1, %s1038_s14 }
   0x6   : > { %p30_p0 = scmp.ge.s32.totalorder %s28_s20, 8  ;;  %p117_p1 = scmp.ne.s32.totalorder %s1038_s14, %s1034_s13 }
   0x7   : > { %p118_p2 = scmp.eq.s32.totalorder %s731_s18, 7  ;;  %p123_p3 = scmp.ne.s32.totalorder %s1034_s13, %s1030_s12 }
   0x8   : > { %s1331_s20 = smov (%p30_p0, %s28_s20), 0  ;;  %p124_p5 = scmp.eq.s32.totalorder %s732_s19, 7 }
   0x9   : > { %p1115_p4 = por %p118_p2, %p117_p1  ;;  %s102_s23 = ssub.s32 %s1046_s16, %s1331_s20 }
   0xa   : > { %p735_p6 = scmp.ge.s32.totalorder %s1050_s17, 1  ;;  %p105_p7 = scmp.eq.s32.totalorder %s102_s23, 0 }
   0xb   : > { %p1122_p8 = por %p124_p5, %p123_p3  ;;  %p164_p9 = scmp.lt.s32.totalorder %s1050_s17, 9 }
   0xc   : > { %s1128_s25 = scalar_select %p105_p7, %s1038_s14, %s107_s21  }
   0xd   : > { %p165_p10 = pnand %p735_p6, %p164_p9 }
   0xe   : > { %s737_s26 = sshll.u32 (!%p165_p10), %s1042_s15, 1  ;;  %s1052_s4 = smov (!%p165_p10), 64  }
   0xf   : > { %168 = sbr.rel (%p165_p10) target bundleno = 332 (0x14c), region = 32  ;;  %p196_p11 = scmp.lt.s32.totalorder (!%p165_p10), %s737_s26, 15 }
  0x10   : > { %s896_s9 = sshll.u32 (!%p165_p10), %s1042_s15, 6  ;;  %s992_s29 = scalar_lea.hbm (!%p165_p10), %s1322_s3, 512 }
  0x11   : > { %s645_s18 = scalar_lea.hbm (!%p165_p10), %s1322_s3, %s896_s9 }
  0x12   : > { %s648_s21 = sshll.u32 (!%p165_p10), %s645_s18, 4  ;;  %s649_s21 = int_to_ptr.hbm [resolvable:$true] %s648_s21 }
  0x13   : > { %s986_s23 = sshra.s32 (!%p165_p10), %s649_s21, 4  ;;  %s987_s23 = int_to_ptr.hbm [resolvable:$true] %s986_s23 }
  0x14   : > { %s1333_s26 = smov (!%p196_p11, %s737_s26), 15  ;;  %v887_v14 = vld [vmem:[%s1320_s1 + $0x38] sm:$0xff]  ;;  %v886_v17 = vld [vmem:[%s1320_s1 + $0x30] sm:$0xff]  ;;  %v885_v22 = vld [vmem:[%s1320_s1 + $0x28] sm:$0xff]  ;;  %vm210_vm0 = vcmask 519168   ;;  %vm246_vm1 = vcmask 1043968   ;;  %p993_p1 = scmp.lt.s32.totalorder %s987_s23, %s1322_s3 }
  0x15   : > { %s871_s27 = sshll.u32 %s1333_s26, 7  ;;  %v895_v15 = vld [vmem:[%s1320_s1 + $0x78] sm:$0xff]  ;;  %565 = vmatpush.bf16.msra.mxu0 %v887_v14  ;;  %897 = vmatpush.bf16.msra.mxu2 %v887_v14  ;;  %v894_v20 = vld [vmem:[%s1320_s1 + $0x70] sm:$0xff]  ;;  %v884_v26 = vld [vmem:[%s1320_s1 + $0x20] sm:$0xff]  ;;  %s988_s26 = scalar_lea.hbm %s987_s23, 64 }
  0x16   : > { %s1134_s30 = scalar_lea.vmem %s1319_s0, %s871_s27  ;;  %905 = vmatpush.bf16.msra.mxu3 %v895_v15  ;;  %594 = vmatpush.bf16.msra.mxu1 %v895_v15  ;;  %v883_v40 = vld [vmem:[%s1320_s1 + $0x18] sm:$0xff]  ;;  %v893_v41 = vld [vmem:[%s1320_s1 + $0x68] sm:$0xff]  ;;  %v882_v42 = vld [vmem:[%s1320_s1 + $0x10] sm:$0xff]  ;;  %p989_p12 = scmp.ne.s32.totalorder %s987_s23, %s988_s26 }
  0x17   : > { %v766_v0 = vld [vmem:[%s1134_s30 + $0xc8] sm:$0xff]  ;;  %v767_v6 = vld [vmem:[%s1134_s30 + $0xd8] sm:$0xff]  ;;  %v208_v38 = vld [vmem:[%s1134_s30] sm:$0xff]  ;;  %p994_p2 = scmp.lt.s32.totalorder %s992_s29, %s988_s26 }
  0x18   : > { %v750_v1 = vld [vmem:[%s1134_s30 + $0x48] sm:$0xff]  ;;  %v358_v2 = vpack.c.bf16 %v766_v0, %v766_v0  ;;  %v751_v7 = vld [vmem:[%s1134_s30 + $0x58] sm:$0xff]  ;;  %v365_v9 = vpack.c.bf16 %v767_v6, %v767_v6  ;;  %v209_v39 = vpack.c.bf16 %v208_v38, %v208_v38  ;;  %v892_v43 = vld [vmem:[%s1320_s1 + $0x60] sm:$0xff]  ;;  %p990_p13 = pnand %p989_p12, %p1115_p4 }
  0x19   : > { %v270_v3 = vpack.c.bf16 %v750_v1, %v750_v1  ;;  %v240_v4 = vld [vmem:[%s1134_s30 + $0x8] sm:$0xff]  ;;  %v747_v8 = vld [vmem:[%s1134_s30 + $0x18] sm:$0xff]  ;;  %v277_v10 = vpack.c.bf16 %v751_v7, %v751_v7  ;;  %566 = vmatpush.bf16.msra.mxu0 %v886_v17  ;;  %898 = vmatpush.bf16.msra.mxu2 %v886_v17  ;;  %v743_v44 = vld [vmem:[%s1134_s30 + $0x40] sm:$0xff]  ;;  %p995_p3 = por %p994_p2, %p993_p1 }
  0x1a   : > { %360 = vrot.lane.b32.xlu1 %v358_v2, %s1052_s4  ;;  %v241_v5 = vpack.c.bf16 %v240_v4, %v240_v4  ;;  %v249_v11 = vpack.c.bf16 %v747_v8, %v747_v8  ;;  %v763_v12 = vld [vmem:[%s1134_s30 + $0x98] sm:$0xff]  ;;  %v762_v13 = vld [vmem:[%s1134_s30 + $0x88] sm:$0xff]  ;;  %906 = vmatpush.bf16.msra.mxu3 %v894_v20  ;;  %211 = vst.msk [vmem:[#allocation2] sm:$0xf] %vm210_vm0, %v209_v39  ;;  %v740_v46 = vld [vmem:[%s1134_s30 + $0x10] sm:$0xff]  ;;  %p991_p0 = pneg %p990_p13 }
  0x1b   : > { %272 = vrot.lane.b32.xlu0 %v270_v3, %s1052_s4  ;;  %v752_v16 = vld [vmem:[%s1134_s30 + $0x68] sm:$0xff]  ;;  %v337_v18 = vpack.c.bf16 %v763_v12, %v763_v12  ;;  %v330_v19 = vpack.c.bf16 %v762_v13, %v762_v13  ;;  %v753_v24 = vld [vmem:[%s1134_s30 + $0x78] sm:$0xff]  ;;  %595 = vmatpush.bf16.msra.mxu1 %v894_v20  ;;  %v226_v45 = vpack.c.bf16 %v743_v44, %v743_v44  ;;  %v758_v48 = vld [vmem:[%s1134_s30 + $0xc0] sm:$0xff] }
  0x1c   : > { %243 = vrot.lane.b32.xlu2 %v241_v5, %s1052_s4  ;;  %v284_v21 = vpack.c.bf16 %v752_v16, %v752_v16  ;;  %v768_v23 = vld [vmem:[%s1134_s30 + $0xe8] sm:$0xff]  ;;  %v769_v25 = vld [vmem:[%s1134_s30 + $0xf8] sm:$0xff]  ;;  %v291_v28 = vpack.c.bf16 %v753_v24, %v753_v24  ;;  %v214_v47 = vpack.c.bf16 %v740_v46, %v740_v46  ;;  %v315_v49 = vpack.c.bf16 %v758_v48, %v758_v48  ;;  %v880_v52 = vld [vmem:[%s1320_s1] sm:$0xff]  ;;  %p996_p5 = pnand %p995_p3, %p991_p0 }
  0x1d   : > { %567 = vmatpush.bf16.msra.mxu0 %v885_v22  ;;  %899 = vmatpush.bf16.msra.mxu2 %v885_v22  ;;  %v372_v27 = vpack.c.bf16 %v768_v23, %v768_v23  ;;  %v379_v29 = vpack.c.bf16 %v769_v25, %v769_v25  ;;  %v749_v30 = vld [vmem:[%s1134_s30 + $0x38] sm:$0xff]  ;;  %v748_v31 = vld [vmem:[%s1134_s30 + $0x28] sm:$0xff]  ;;  %227 = vst.msk [vmem:[#allocation2 + $0x20] sm:$0xf] %vm210_vm0, %v226_v45  ;;  %v890_v53 = vld [vmem:[%s1320_s1 + $0x50] sm:$0xff] }
  0x1e   : > { %v764_v32 = vld [vmem:[%s1134_s30 + $0xa8] sm:$0xff]  ;;  %v263_v33 = vpack.c.bf16 %v749_v30, %v749_v30  ;;  %v256_v34 = vpack.c.bf16 %v748_v31, %v748_v31  ;;  %v765_v36 = vld [vmem:[%s1134_s30 + $0xb8] sm:$0xff]  ;;  %907 = vmatpush.bf16.msra.mxu3 %v893_v41  ;;  %215 = vst.msk [vmem:[#allocation2 + $0x8] sm:$0xf] %vm210_vm0, %v214_v47  ;;  %v759_v54 = vld [vmem:[%s1134_s30 + $0xd0] sm:$0xff] }
  0x1f   : > { %v344_v35 = vpack.c.bf16 %v764_v32, %v764_v32  ;;  %v351_v37 = vpack.c.bf16 %v765_v36, %v765_v36  ;;  %596 = vmatpush.bf16.msra.mxu1 %v893_v41  ;;  %v881_v50 = vld [vmem:[%s1320_s1 + $0x8] sm:$0xff]  ;;  %v891_v51 = vld [vmem:[%s1320_s1 + $0x58] sm:$0xff]  ;;  %316 = vst.msk [vmem:[#allocation2 + $0x24] sm:$0xf] %vm210_vm0, %v315_v49  ;;  %v744_v55 = vld [vmem:[%s1134_s30 + $0x50] sm:$0xff]  ;;  %v319_v56 = vpack.c.bf16 %v759_v54, %v759_v54 }
  0x20   : > { %v230_v57 = vpack.c.bf16 %v744_v55, %v744_v55  ;;  %v889_v59 = vld [vmem:[%s1320_s1 + $0x48] sm:$0xff]  ;;  %v888_v60 = vld [vmem:[%s1320_s1 + $0x40] sm:$0xff]  ;;  %v755_v61 = vld [vmem:[%s1134_s30 + $0x90] sm:$0xff] }
  0x21   : > { %568 = vmatpush.bf16.msra.mxu0 %v884_v26  ;;  %900 = vmatpush.bf16.msra.mxu2 %v884_v26  ;;  %320 = vst.msk [vmem:[#allocation2 + $0x2c] sm:$0xf] %vm210_vm0, %v319_v56  ;;  %v754_v62 = vld [vmem:[%s1134_s30 + $0x80] sm:$0xff]  ;;  %v303_v63 = vpack.c.bf16 %v755_v61, %v755_v61  ;;  %v746_v5 = vld [vmem:[%s1134_s30 + $0x70] sm:$0xff] }
  0x22   : > { %367 = vrot.lane.b32.xlu1 %v365_v9, %s1052_s4  ;;  %908 = vmatpush.bf16.msra.mxu3 %v892_v43  ;;  %231 = vst.msk [vmem:[#allocation2 + $0x28] sm:$0xf] %vm210_vm0, %v230_v57  ;;  %v299_v0 = vpack.c.bf16 %v754_v62, %v754_v62  ;;  %v745_v2 = vld [vmem:[%s1134_s30 + $0x60] sm:$0xff]  ;;  %v761_v6 = vld [vmem:[%s1134_s30 + $0xf0] sm:$0xff]  ;;  %v238_v8 = vpack.c.bf16 %v746_v5, %v746_v5 }
  0x23   : > { %279 = vrot.lane.b32.xlu0 %v277_v10, %s1052_s4  ;;  %597 = vmatpush.bf16.msra.mxu1 %v892_v43  ;;  %304 = vst.msk [vmem:[#allocation2 + $0xc] sm:$0xf] %vm210_vm0, %v303_v63  ;;  %v234_v3 = vpack.c.bf16 %v745_v2, %v745_v2  ;;  %v760_v4 = vld [vmem:[%s1134_s30 + $0xe0] sm:$0xff]  ;;  %v327_v10 = vpack.c.bf16 %v761_v6, %v761_v6  ;;  %v742_v14 = vld [vmem:[%s1134_s30 + $0x30] sm:$0xff] }
  0x24   : > { %251 = vrot.lane.b32.xlu2 %v249_v11, %s1052_s4  ;;  %300 = vst.msk [vmem:[#allocation2 + $0x4] sm:$0xf] %vm210_vm0, %v299_v0  ;;  %v323_v7 = vpack.c.bf16 %v760_v4, %v760_v4  ;;  %v741_v15 = vld [vmem:[%s1134_s30 + $0x20] sm:$0xff] }
  0x25   : > { %569 = vmatpush.bf16.msra.mxu0 %v883_v40  ;;  %901 = vmatpush.bf16.msra.mxu2 %v883_v40  ;;  %235 = vst.msk [vmem:[#allocation2 + $0x30] sm:$0xf] %vm210_vm0, %v234_v3  ;;  %v756_v23 = vld [vmem:[%s1134_s30 + $0xa0] sm:$0xff] }
  0x26   : > { %909 = vmatpush.bf16.msra.mxu3 %v891_v51  ;;  %324 = vst.msk [vmem:[#allocation2 + $0x34] sm:$0xf] %vm210_vm0, %v323_v7  ;;  %v307_v24 = vpack.c.bf16 %v756_v23, %v756_v23  ;;  %v971_v57 = vld [vmem:[%s1321_s2] ss:$0 sm:$0xff] }
  0x27   : > { %598 = vmatpush.bf16.msra.mxu1 %v891_v51  ;;  %239 = vst.msk [vmem:[#allocation2 + $0x38] sm:$0xf] %vm210_vm0, %v238_v8 }
  0x28   : > { %328 = vst.msk [vmem:[#allocation2 + $0x3c] sm:$0xf] %vm210_vm0, %v327_v10 }
  0x29   : > { %570 = vmatpush.bf16.msra.mxu0 %v882_v42  ;;  %902 = vmatpush.bf16.msra.mxu2 %v882_v42  ;;  %308 = vst.msk [vmem:[#allocation2 + $0x14] sm:$0xf] %vm210_vm0, %v307_v24 }
  0x2a   : > { %339 = vrot.lane.b32.xlu1 %v337_v18, %s1052_s4  ;;  %910 = vmatpush.bf16.msra.mxu3 %v890_v53  ;;  %v222_v18 = vpack.c.bf16 %v742_v14, %v742_v14 }
  0x2b   : > { %332 = vrot.lane.b32.xlu0 %v330_v19, %s1052_s4  ;;  %599 = vmatpush.bf16.msra.mxu1 %v890_v53  ;;  %v218_v19 = vpack.c.bf16 %v741_v15, %v741_v15 }
  0x2c   : > { %286 = vrot.lane.b32.xlu2 %v284_v21, %s1052_s4  ;;  %223 = vst.msk [vmem:[#allocation2 + $0x18] sm:$0xf] %vm210_vm0, %v222_v18  ;;  %v757_v21 = vld [vmem:[%s1134_s30 + $0xb0] sm:$0xff]  ;;  %s191_s30 = sand.u32 1, %s1034_s13  }
  0x2d   : > { %571 = vmatpush.bf16.msra.mxu0 %v881_v50  ;;  %903 = vmatpush.bf16.msra.mxu2 %v881_v50  ;;  %219 = vst.msk [vmem:[#allocation2 + $0x10] sm:$0xf] %vm210_vm0, %v218_v19  ;;  %v311_v22 = vpack.c.bf16 %v757_v21, %v757_v21  ;;  %s736_s7 = sshll.u32 %s191_s30, 6  ;;  %s632_s15 = scalar_lea.sflag [#allocation4], %s191_s30 }
  0x2e   : > { %911 = vmatpush.bf16.msra.mxu3 %v889_v59  ;;  %s1270_s8 = scalar_lea.vmem [#allocation3], %s736_s7 }
  0x2f   : > { %600 = vmatpush.bf16.msra.mxu1 %v889_v59  ;;  %312 = vst.msk [vmem:[#allocation2 + $0x1c] sm:$0xf] %vm210_vm0, %v311_v22  ;;  %s646_s19 = sshll.u32 %s1270_s8, 4  ;;  %s647_s19 = int_to_ptr.vmem [resolvable:$true] %s646_s19 }
  0x31   : > { %572 = vmatpush.bf16.msra.mxu0 %v880_v52  ;;  %904 = vmatpush.bf16.msra.mxu2 %v880_v52 }
  0x32   : > { %374 = vrot.lane.b32.xlu1 %v372_v27, %s1052_s4  ;;  %912 = vmatpush.bf16.msra.mxu3 %v888_v60 }
  0x33   : > { %293 = vrot.lane.b32.xlu0 %v291_v28, %s1052_s4  ;;  %601 = vmatpush.bf16.msra.mxu1 %v888_v60 }
  0x34   : > { %381 = vrot.lane.b32.xlu2 %v379_v29, %s1052_s4 }
  0x3a   : > { %265 = vrot.lane.b32.xlu1 %v263_v33, %s1052_s4 }
  0x3b   : > { %258 = vrot.lane.b32.xlu0 %v256_v34, %s1052_s4 }
  0x3c   : > { %346 = vrot.lane.b32.xlu2 %v344_v35, %s1052_s4 }
  0x43   : > { %353 = vrot.lane.b32.xlu0 %v351_v37, %s1052_s4 }
  0x76   : > { %v244_v58 = vpop.permute.xlu2 %243 }
  0x77   : > { %247 = vst.msk [vmem:[#allocation2] sm:$0xf] %vm246_vm1, %v244_v58 }
  0x7e   : > { %v252_v1 = vpop.permute.xlu2 %251  ;;  %v772_v9 = vld [vmem:[#allocation2] sm:$0xf] }
  0x7f   : > { %254 = vst.msk [vmem:[#allocation2 + $0x8] sm:$0xf] %vm246_vm1, %v252_v1 }
  0x86   : > { %v873_v11 = vld [vmem:[#allocation2 + $0x4] sm:$0xf0]  ;;  %v287_v12 = vpop.permute.xlu2 %286 }
  0x87   : > { %v773_v13 = vor.u32 %v873_v11, %v772_v9  ;;  %289 = vst.msk [vmem:[#allocation2 + $0x30] sm:$0xf] %vm246_vm1, %v287_v12 }
  0x89   : > { %573 = vmatmul.bf16.vlgmr.msra.gmra.mxu0 %v773_v13 }
  0x8c   : > { %v361_v16 = vpop.permute.xlu1 %360 }
  0x8d   : > { %v273_v17 = vpop.permute.xlu0 %272  ;;  %363 = vst.msk [vmem:[#allocation2 + $0x24] sm:$0xf] %vm246_vm1, %v361_v16 }
  0x8e   : > { %275 = vst.msk [vmem:[#allocation2 + $0x20] sm:$0xf] %vm246_vm1, %v273_v17  ;;  %v382_v20 = vpop.permute.xlu2 %381  ;;  %v796_v42 = vld [vmem:[#allocation2 + $0x30] sm:$0xf] }
  0x8f   : > { %384 = vst.msk [vmem:[#allocation2 + $0x3c] sm:$0xf] %vm246_vm1, %v382_v20 }
  0x94   : > { %v368_v25 = vpop.permute.xlu1 %367  ;;  %v876_v30 = vld [vmem:[#allocation2 + $0x24] sm:$0xf] }
  0x95   : > { %v280_v26 = vpop.permute.xlu0 %279  ;;  %370 = vst.msk [vmem:[#allocation2 + $0x2c] sm:$0xf] %vm246_vm1, %v368_v25  ;;  %v788_v32 = vld [vmem:[#allocation2 + $0x20] sm:$0xf] }
  0x96   : > { %282 = vst.msk [vmem:[#allocation2 + $0x28] sm:$0xf] %vm246_vm1, %v280_v26  ;;  %v347_v27 = vpop.permute.xlu2 %346  ;;  %v798_v41 = vld [vmem:[#allocation2 + $0x38] sm:$0xf0] }
  0x97   : > { %349 = vst.msk [vmem:[#allocation2 + $0x14] sm:$0xf] %vm246_vm1, %v347_v27 }
  0x9c   : > { %v340_v28 = vpop.permute.xlu1 %339  ;;  %v790_v31 = vld [vmem:[#allocation2 + $0x28] sm:$0xf0] }
  0x9d   : > { %v333_v29 = vpop.permute.xlu0 %332  ;;  %342 = vst.msk [vmem:[#allocation2 + $0xc] sm:$0xf] %vm246_vm1, %v340_v28  ;;  %v877_v33 = vld [vmem:[#allocation2 + $0x24] sm:$0xf0]  ;;  %v793_v34 = vor.u32 %v876_v30, %v790_v31 }
  0x9e   : > { %335 = vst.msk [vmem:[#allocation2 + $0x4] sm:$0xf] %vm246_vm1, %v333_v29  ;;  %v789_v35 = vor.u32 %v877_v33, %v788_v32  ;;  %v874_v53 = vld [vmem:[#allocation2 + $0x14] sm:$0xf] }
  0x9f   : > { %612 = vmatmul.bf16.vlgmr.msra.gmra.mxu3 %v793_v34 }
  0xa0   : > { %583 = vmatmul.bf16.vlgmr.msra.gmra.mxu2 %v789_v35 }
  0xa4   : > { %v375_v36 = vpop.permute.xlu1 %374  ;;  %v774_v38 = vld [vmem:[#allocation2 + $0x8] sm:$0xf0] }
  0xa5   : > { %v294_v37 = vpop.permute.xlu0 %293  ;;  %377 = vst.msk [vmem:[#allocation2 + $0x34] sm:$0xf] %vm246_vm1, %v375_v36  ;;  %v872_v39 = vld [vmem:[#allocation2 + $0x4] sm:$0xf] }
  0xa6   : > { %296 = vst.msk [vmem:[#allocation2 + $0x38] sm:$0xf] %vm246_vm1, %v294_v37  ;;  %v777_v40 = vor.u32 %v872_v39, %v774_v38 }
  0xa8   : > { %602 = vmatmul.bf16.vlgmr.msra.gmra.mxu1 %v777_v40 }
  0xac   : > { %v266_v43 = vpop.permute.xlu1 %265  ;;  %v878_v45 = vld [vmem:[#allocation2 + $0x34] sm:$0xf] }
  0xad   : > { %v259_v44 = vpop.permute.xlu0 %258  ;;  %268 = vst.msk [vmem:[#allocation2 + $0x18] sm:$0xf] %vm246_vm1, %v266_v43  ;;  %v879_v46 = vld [vmem:[#allocation2 + $0x34] sm:$0xf0]  ;;  %v801_v47 = vor.u32 %v878_v45, %v798_v41 }
  0xae   : > { %261 = vst.msk [vmem:[#allocation2 + $0x10] sm:$0xf] %vm246_vm1, %v259_v44  ;;  %v797_v48 = vor.u32 %v879_v46, %v796_v42 }
  0xaf   : > { %617 = vmatmul.bf16.gmra.mxu3 %v801_v47 }
  0xb0   : > { %588 = vmatmul.bf16.gmra.mxu2 %v797_v48 }
  0xb4   : > { %v875_v50 = vld [vmem:[#allocation2 + $0x14] sm:$0xf0] }
  0xb5   : > { %v354_v49 = vpop.permute.xlu0 %353  ;;  %v780_v51 = vld [vmem:[#allocation2 + $0x10] sm:$0xf] }
  0xb6   : > { %356 = vst.msk [vmem:[#allocation2 + $0x1c] sm:$0xf] %vm246_vm1, %v354_v49  ;;  %v781_v52 = vor.u32 %v875_v50, %v780_v51 }
  0xb8   : > { %578 = vmatmul.bf16.gmra.mxu0 %v781_v52 }
  0xbd   : > { %v782_v54 = vld [vmem:[#allocation2 + $0x18] sm:$0xf0] }
  0xbe   : > { %v785_v55 = vor.u32 %v874_v53, %v782_v54 }
  0xc0   : > { %607 = vmatmul.bf16.gmra.mxu1 %v785_v55 }
 0x106   : > { %v574_v56 = vpop.f32.mrf.mxu0 }
 0x107   : > { %v575_v60 = vadd.f32 %v971_v57, %v574_v56 }
 0x10e   : > { %v576_v1 = vpop.f32.mrf.mxu0 }
 0x10f   : > { %v577_v4 = vadd.f32 %v971_v57, %v576_v1 }
 0x122   : > { %v613_v58 = vpop.f32.mrf.mxu3 }
 0x123   : > { %v584_v59 = vpop.f32.mrf.mxu2 }
 0x124   : > { %v585_v61 = vadd.f32 %v971_v57, %v584_v59 }
 0x125   : > { %v603_v62 = vpop.f32.mrf.mxu1 }
 0x126   : > { %v614_v63 = vadd.f32 %v613_v58, %v585_v61  ;;  %v604_v0 = vadd.f32 %v603_v62, %v575_v60 }
 0x128   : > { %627 = vst [vmem:[%s1270_s8 + $0x20] sm:$0xff] %v614_v63 }
 0x129   : > { %623 = vst [vmem:[%s1270_s8] sm:$0xff] %v604_v0 }
 0x12a   : > { %v615_v2 = vpop.f32.mrf.mxu3 }
 0x12b   : > { %v586_v3 = vpop.f32.mrf.mxu2 }
 0x12c   : > { %v587_v5 = vadd.f32 %v971_v57, %v586_v3 }
 0x12d   : > { %v605_v6 = vpop.f32.mrf.mxu1 }
 0x12e   : > { %v616_v7 = vadd.f32 %v615_v2, %v587_v5  ;;  %v606_v8 = vadd.f32 %v605_v6, %v577_v4 }
 0x130   : > { %628 = vst [vmem:[%s1270_s8 + $0x28] sm:$0xff] %v616_v7 }
 0x131   : > { %624 = vst [vmem:[%s1270_s8 + $0x8] sm:$0xff] %v606_v8 }
 0x132   : > { %v618_v10 = vpop.f32.mrf.mxu3 }
 0x133   : > { %v589_v9 = vpop.f32.mrf.mxu2 }
 0x134   : > { %v590_v11 = vadd.f32 %v971_v57, %v589_v9 }
 0x135   : > { %v579_v13 = vpop.f32.mrf.mxu0 }
 0x136   : > { %v619_v12 = vadd.f32 %v618_v10, %v590_v11  ;;  %v580_v14 = vadd.f32 %v971_v57, %v579_v13 }
 0x138   : > { %629 = vst [vmem:[%s1270_s8 + $0x30] sm:$0xff] %v619_v12 }
 0x13a   : > { %v620_v18 = vpop.f32.mrf.mxu3 }
 0x13b   : > { %v591_v15 = vpop.f32.mrf.mxu2 }
 0x13c   : > { %v592_v16 = vadd.f32 %v971_v57, %v591_v15 }
 0x13d   : > { %v608_v17 = vpop.f32.mrf.mxu1  ;;  %v581_v21 = vpop.f32.mrf.mxu0 }
 0x13e   : > { %v609_v19 = vadd.f32 %v608_v17, %v580_v14  ;;  %v621_v20 = vadd.f32 %v620_v18, %v592_v16  ;;  %v582_v22 = vadd.f32 %v971_v57, %v581_v21 }
 0x140   : > { %625 = vst [vmem:[%s1270_s8 + $0x10] sm:$0xff] %v609_v19 }
 0x141   : > { %630 = vst [vmem:[%s1270_s8 + $0x38] sm:$0xff] %v621_v20 }
 0x145   : > { %v610_v23 = vpop.f32.mrf.mxu1 }
 0x146   : > { %v611_v24 = vadd.f32 %v610_v23, %v582_v22 }
 0x148   : > { %626 = vst [vmem:[%s1270_s8 + $0x18] sm:$0xff] %v611_v24 }
 0x149   : > { %999 = shalt.err (!%p996_p5)
}
 0x14a   : > { %s1053_s30 = smov 128   ;;  %s1054_s4 = smov 8  }
 0x14b   : > { %913 = dma.vmem_to_hbm [thread:$0]  (%p1115_p4), %s647_s19, 1024, %s649_s21, %s632_s15, %s1053_s30, %s1053_s30, %s1054_s4  }
 0x14c PF: > { %p919_p6 = scmp.ge.s32.totalorder %s1050_s17, 2  ;;  %s663_s7 = sand.u32 1, %s1030_s12  }
 0x14d   : > { %s664_s8 = scalar_lea.sflag [#allocation4], %s663_s7 }
 0x14e   : > { %p916_p7 = pnand %p919_p6, %p1122_p8 }
 0x150   : > { %p917_p9 = pneg %p916_p7 }
 0x152   : > { %1025 = dma.done.wait (%p917_p9), %s664_s8, 1024  }
 0x153   : > { %1027 = vsyncadd (%p917_p9), %s664_s8, 4294966272  ;;  %s16_s17 = sadd.s32 1, %s1050_s17   ;;  %s1325_s12 = smov %s1034_s13 }
 0x154   : > { %p13_p10 = scmp.ge.s32.totalorder %s16_s17, 10   ;;  %s1326_s13 = smov %s1038_s14 }
 0x155   : > { %s1327_s14 = smov %s1128_s25  ;;  %s1328_s15 = smov %s1046_s16 }
 0x156   : > { %s1329_s16 = smov %s1331_s20  ;;  %15 = sbr.rel (!%p13_p10) target bundleno = 4 (0x4), region = 82 }
 0x15b   :  { %670 = vsyncpa [#allocation4], 1 }
 0x15c   :  { %672 = vsyncpa [#allocation4 + $0x1], 1 }

</bundles_post_ra>
